<compile_context>
chip_gen: v6e
topology: v6e:2x2x1
jax: 0.10.0
libtpu: 0.0.40
codegen_flags: <defaults>
</compile_context>

<pallas_src>
import functools
import math

import jax
import jax.numpy as jnp
from jax.experimental import pallas as pl
from jax.experimental.pallas import tpu as pltpu


# ----------------------------------------------------------------------------
# Tile-size helpers (keep blocks (8,128)-legal and VMEM-safe on v5e/v6e/v7x)
# ----------------------------------------------------------------------------
def _pick_lane_tile(dim, cap):
    """Largest multiple-of-128 tile <= cap dividing dim, else the full dim."""
    if dim <= cap:
        return dim
    t = (cap // 128) * 128
    while t >= 128:
        if dim % t == 0:
            return t
        t -= 128
    return dim


def _pick_sublane_tile(dim, cap):
    """Largest multiple-of-8 tile <= cap dividing dim, else the full dim."""
    if dim <= cap:
        return dim
    t = (cap // 8) * 8
    while t >= 8:
        if dim % t == 0:
            return t
        t -= 8
    return dim


# ----------------------------------------------------------------------------
# Kernel 1: tiled dense linear  y = x @ W_t + b   (W_t already (K, N) bf16)
# ----------------------------------------------------------------------------
def _linear_kernel(x_ref, w_ref, b_ref, o_ref, acc_ref):
    k = pl.program_id(2)

    @pl.when(k == 0)
    def _():
        acc_ref[...] = jnp.zeros_like(acc_ref)

    acc_ref[...] += jnp.dot(x_ref[...], w_ref[...],
                            preferred_element_type=jnp.float32)

    @pl.when(k == pl.num_programs(2) - 1)
    def _():
        o_ref[...] = (acc_ref[...]
                      + b_ref[...].astype(jnp.float32)).astype(o_ref.dtype)


def linear(x2d, w_t, b, *, out_dtype=None, tm_cap=512, tn_cap=256, tk_cap=1024):
    """x2d: (M, K) bf16 activations; w_t: (K, N) bf16; b: (N,) f32."""
    M, K = x2d.shape
    N = w_t.shape[1]
    out_dtype = x2d.dtype if out_dtype is None else out_dtype
    tm = _pick_sublane_tile(M, tm_cap)
    tn = _pick_lane_tile(N, tn_cap)
    tk = _pick_lane_tile(K, tk_cap)
    grid = (M // tm, N // tn, K // tk)
    return pl.pallas_call(
        _linear_kernel,
        out_shape=jax.ShapeDtypeStruct((M, N), out_dtype),
        grid=grid,
        in_specs=[
            pl.BlockSpec((tm, tk), lambda i, j, k: (i, k)),
            pl.BlockSpec((tk, tn), lambda i, j, k: (k, j)),   # weight (K, N)
            pl.BlockSpec((1, tn), lambda i, j, k: (0, j)),    # bias row
        ],
        out_specs=pl.BlockSpec((tm, tn), lambda i, j, k: (i, j)),
        scratch_shapes=[pltpu.VMEM((tm, tn), jnp.float32)],
        compiler_params=pltpu.CompilerParams(
            dimension_semantics=("parallel", "parallel", "arbitrary")),
    )(x2d, w_t, b.reshape(1, N))


# ----------------------------------------------------------------------------
# Kernel 2: causal flash attention, grid (B, T/t, T/t), per-head unrolled loop
# ----------------------------------------------------------------------------
_MASK_VALUE = -1e30   # large finite negative: no NaNs even for masked entries


def _flash_attn_kernel(q_ref, k_ref, v_ref, o_ref, m_ref, l_ref, acc_ref,
                       *, num_heads, scale):
    qi = pl.program_id(1)
    kvi = pl.program_id(2)
    tq = q_ref.shape[1]
    tkv = k_ref.shape[1]
    C = q_ref.shape[2]
    D = C // num_heads

    @pl.when(kvi == 0)
    def _():
        m_ref[...] = jnp.full_like(m_ref, _MASK_VALUE)
        l_ref[...] = jnp.zeros_like(l_ref)
        acc_ref[...] = jnp.zeros_like(acc_ref)

    def tile_update(apply_mask):
        if apply_mask:
            # Diagonal tile (tq == tkv => q_start == kv_start): local offsets.
            rows = jax.lax.broadcasted_iota(jnp.int32, (tq, tkv), 0)
            cols = jax.lax.broadcasted_iota(jnp.int32, (tq, tkv), 1)
            keep = cols <= rows
        for h in range(num_heads):            # static unroll over heads
            lo = h * D
            hi = lo + D
            # Scale folded into q at load (tq*D muls per head, not tq*tkv).
            q_h = (q_ref[0, :, lo:hi] * scale).astype(jnp.bfloat16)  # (tq, D)
            k_h = k_ref[0, :, lo:hi].astype(jnp.bfloat16)            # (tkv, D)
            v_h = v_ref[0, :, lo:hi].astype(jnp.bfloat16)            # (tkv, D)

            # q @ k^T without materializing a transpose (contract D vs D).
            s = jax.lax.dot_general(
                q_h, k_h, (((1,), (1,)), ((), ())),
                preferred_element_type=jnp.float32)                  # (tq, tkv)
            if apply_mask:
                s = jnp.where(keep, s, _MASK_VALUE)

            m_prev = m_ref[h]                                        # (tq, 1)
            l_prev = l_ref[h]
            m_next = jnp.maximum(m_prev, jnp.max(s, axis=-1, keepdims=True))
            alpha = jnp.exp(m_prev - m_next)
            p = jnp.exp(s - m_next)
            l_ref[h] = alpha * l_prev + jnp.sum(p, axis=-1, keepdims=True)
            acc_ref[h] = alpha * acc_ref[h] + jnp.dot(
                p.astype(jnp.bfloat16), v_h,
                preferred_element_type=jnp.float32)
            m_ref[h] = m_next

    # Strictly-past KV tiles need no mask at all.
    @pl.when(kvi < qi)
    def _():
        tile_update(apply_mask=False)

    # Diagonal tile: apply the causal mask.  Future tiles (kvi > qi) are
    # skipped entirely (and their DMA is avoided by the clamped index_map).
    @pl.when(kvi == qi)
    def _():
        tile_update(apply_mask=True)

    @pl.when(kvi == pl.num_programs(2) - 1)
    def _():
        for h in range(num_heads):
            inv_l = pl.reciprocal(l_ref[h], approx=True)   # EUP, not VPU divide
            o_ref[0, :, h * D:(h + 1) * D] = (
                acc_ref[h] * inv_l).astype(o_ref.dtype)


def causal_attention(qkv, num_heads, *, tile_cap=256):
    """qkv: (B, T, 3C) bf16 with heads packed along C (PyTorch layout)."""
    B, T, C3 = qkv.shape
    C = C3 // 3
    D = C // num_heads
    t = _pick_sublane_tile(T, tile_cap)       # tq == tkv (clamp/skip assume it)
    grid = (B, T // t, T // t)
    kernel = functools.partial(_flash_attn_kernel,
                               num_heads=num_heads, scale=1.0 / math.sqrt(D))

    if C % 128 == 0:
        # q/k/v selected straight from the packed qkv via last-axis block
        # index (0 / 1 / 2); KV block index clamped so fully-future (masked)
        # tiles are never fetched.
        inputs = (qkv, qkv, qkv)
        q_spec = pl.BlockSpec((1, t, C), lambda b, i, j: (b, i, 0))
        k_spec = pl.BlockSpec((1, t, C), lambda b, i, j: (b, jnp.minimum(j, i), 1))
        v_spec = pl.BlockSpec((1, t, C), lambda b, i, j: (b, jnp.minimum(j, i), 2))
    else:
        # Lane-unaligned C: fall back to a wrapper split so every block covers
        # the full last dim and stays (8,128)-legal.
        q, k, v = jnp.split(qkv, 3, axis=-1)
        inputs = (q, k, v)
        q_spec = pl.BlockSpec((1, t, C), lambda b, i, j: (b, i, 0))
        k_spec = pl.BlockSpec((1, t, C), lambda b, i, j: (b, jnp.minimum(j, i), 0))
        v_spec = k_spec

    return pl.pallas_call(
        kernel,
        out_shape=jax.ShapeDtypeStruct((B, T, C), qkv.dtype),
        grid=grid,
        in_specs=[q_spec, k_spec, v_spec],
        out_specs=pl.BlockSpec((1, t, C), lambda b, i, j: (b, i, 0)),
        scratch_shapes=[
            pltpu.VMEM((num_heads, t, 1), jnp.float32),   # running max  m
            pltpu.VMEM((num_heads, t, 1), jnp.float32),   # running sum  l
            pltpu.VMEM((num_heads, t, D), jnp.float32),   # output accumulator
        ],
        compiler_params=pltpu.CompilerParams(
            dimension_semantics=("parallel", "parallel", "arbitrary")),
    )(*inputs)


# ----------------------------------------------------------------------------
# Module forward (weights prepped once: transpose to (K, N) + bf16)
# ----------------------------------------------------------------------------
def multiheaded_self_attention(x, params, num_heads):
    B, T, C = x.shape
    w_attn, b_attn, w_proj, b_proj = params

    # One-time weight prep (in a real model this is done at load time).
    w_attn_t = w_attn.T.astype(jnp.bfloat16)      # (C, 3C)
    w_proj_t = w_proj.T.astype(jnp.bfloat16)      # (C, C)
    x_bf = x.astype(jnp.bfloat16)

    # qkv projection: (B*T, C) @ W_attn_t + b -> (B, T, 3C) bf16
    qkv = linear(x_bf.reshape(B * T, C), w_attn_t, b_attn,
                 out_dtype=jnp.bfloat16).reshape(B, T, 3 * C)

    # Causal attention straight on the packed qkv (no wrapper split).
    y = causal_attention(qkv, num_heads)          # (B, T, C) bf16

    out = linear(y.reshape(B * T, C), w_proj_t, b_proj, out_dtype=x.dtype)
    return out.reshape(B, T, C)


def init_params(key, embed_dim):
    """Deterministic PyTorch-style (uniform +-1/sqrt(fan_in)) init, f32."""
    k1, k2, k3, k4 = jax.random.split(key, 4)
    bound = 1.0 / math.sqrt(embed_dim)
    w_attn = jax.random.uniform(k1, (3 * embed_dim, embed_dim),
                                jnp.float32, -bound, bound)
    b_attn = jax.random.uniform(k2, (3 * embed_dim,),
                                jnp.float32, -bound, bound)
    w_proj = jax.random.uniform(k3, (embed_dim, embed_dim),
                                jnp.float32, -bound, bound)
    b_proj = jax.random.uniform(k4, (embed_dim,),
                                jnp.float32, -bound, bound)
    return (w_attn, b_attn, w_proj, b_proj)


# ----------------------------------------------------------------------------
# Pure-JAX reference (f32) for a correctness sanity check
# ----------------------------------------------------------------------------
def reference_mhsa(x, params, num_heads):
    B, T, C = x.shape
    D = C // num_heads
    w_attn, b_attn, w_proj, b_proj = params
    qkv = x @ w_attn.T + b_attn
    q, k, v = jnp.split(qkv, 3, axis=-1)

    def heads(t):
        return t.reshape(B, T, num_heads, D).transpose(0, 2, 1, 3)

    q, k, v = heads(q), heads(k), heads(v)
    s = (q @ jnp.swapaxes(k, -1, -2)) / math.sqrt(D)
    mask = jnp.tril(jnp.ones((T, T), dtype=bool))
    s = jnp.where(mask, s, -jnp.inf)
    p = jax.nn.softmax(s, axis=-1)
    y = (p @ v).transpose(0, 2, 1, 3).reshape(B, T, C)
    return y @ w_proj.T + b_proj


def _check(B, T, C, H, key):
    kx, kp = jax.random.split(key)
    x = jax.random.normal(kx, (B, T, C), jnp.float32)
    params = init_params(kp, C)
    out = jax.block_until_ready(
        multiheaded_self_attention(x, params, num_heads=H))
    assert out.shape == (B, T, C)
    assert bool(jnp.isfinite(out).all())
    ref = reference_mhsa(x, params, num_heads=H)
    max_err = float(jnp.max(jnp.abs(out - ref)))
    assert max_err < 1e-1, (
        f"mismatch vs reference at (B={B},T={T},C={C},H={H}): "
        f"max abs err = {max_err}")


if __name__ == "__main__":
    key = jax.random.PRNGKey(0)
    k1, k2 = jax.random.split(key)
    # Lane-aligned config: packed-qkv BlockSpec slicing path (C % 128 == 0).
    _check(B=2, T=16, C=128, H=4, key=k1)
    # Small unaligned config: exercises the split fallback path.
    _check(B=2, T=8, C=32, H=4, key=k2)
    print("KERNEL_OK")
</pallas_src>

<mosaic_0001>
module attributes {stable_mosaic.version = 11 : i64} {
  func.func @_linear_kernel(%arg0: i32, %arg1: i32, %arg2: i32, %arg3: memref<32x128xbf16, #tpu.memory_space<vmem>>, %arg4: memref<128x128xbf16, #tpu.memory_space<vmem>>, %arg5: memref<1x128xf32, #tpu.memory_space<vmem>>, %arg6: memref<32x128xbf16, #tpu.memory_space<vmem>>, %arg7: memref<32x128xf32, #tpu.memory_space<vmem>>) attributes {dimension_semantics = [#tpu.dimension_semantics<parallel>, #tpu.dimension_semantics<parallel>, #tpu.dimension_semantics<arbitrary>], iteration_bounds = array<i64: 1, 3, 1>, scalar_prefetch = 0 : i64, scratch_operands = 1 : i64, tpu.core_type = #tpu.core_type<tc>, window_params = [{transform_indices = @transform_0, window_bounds = array<i64: 32, 128>}, {transform_indices = @transform_1, window_bounds = array<i64: 128, 128>}, {transform_indices = @transform_2, window_bounds = array<i64: 1, 128>}, {transform_indices = @transform_3, window_bounds = array<i64: 32, 128>}]} {
    %c0_i32 = arith.constant 0 : i32
    %0 = arith.cmpi eq, %arg2, %c0_i32 : i32
    %1 = arith.extui %0 : i1 to i32
    %c0_i32_0 = arith.constant 0 : i32
    %2 = arith.cmpi ne, %1, %c0_i32_0 : i32
    scf.if %2 {
      %cst_10 = arith.constant 0.000000e+00 : f32
      %12 = vector.broadcast %cst_10 : f32 to vector<32x128xf32>
      %c0_11 = arith.constant 0 : index
      %c0_12 = arith.constant 0 : index
      %13 = vector.load %arg7[%c0_11, %c0_12] : memref<32x128xf32, #tpu.memory_space<vmem>>, vector<32x128xf32>
      tpu.vector_store %arg7[%c0_11, %c0_12], %12 {strides = array<i32>} : memref<32x128xf32, #tpu.memory_space<vmem>>, vector<32x128xf32>,
    } else {
    }
    %c0 = arith.constant 0 : index
    %c0_1 = arith.constant 0 : index
    %3 = vector.load %arg7[%c0, %c0_1] : memref<32x128xf32, #tpu.memory_space<vmem>>, vector<32x128xf32>
    %c0_2 = arith.constant 0 : index
    %c0_3 = arith.constant 0 : index
    %4 = vector.load %arg3[%c0_2, %c0_3] : memref<32x128xbf16, #tpu.memory_space<vmem>>, vector<32x128xbf16>
    %c0_4 = arith.constant 0 : index
    %c0_5 = arith.constant 0 : index
    %5 = vector.load %arg4[%c0_4, %c0_5] : memref<128x128xbf16, #tpu.memory_space<vmem>>, vector<128x128xbf16>
    %cst = arith.constant dense<0.000000e+00> : vector<32x128xf32>
    %6 = tpu.matmul %4, %5, %cst {dimension_numbers = #tpu.dot_dimension_numbers<[1], [0], [0], [1], [0, 0, 1, 1], [], []>} : vector<32x128xbf16>, vector<128x128xbf16>, vector<32x128xf32> -> vector<32x128xf32>
    %7 = arith.addf %3, %6 : vector<32x128xf32>
    %c0_6 = arith.constant 0 : index
    %c0_7 = arith.constant 0 : index
    %8 = vector.load %arg7[%c0_6, %c0_7] : memref<32x128xf32, #tpu.memory_space<vmem>>, vector<32x128xf32>
    tpu.vector_store %arg7[%c0_6, %c0_7], %7 {strides = array<i32>} : memref<32x128xf32, #tpu.memory_space<vmem>>, vector<32x128xf32>,
    %c0_i32_8 = arith.constant 0 : i32
    %9 = arith.cmpi eq, %arg2, %c0_i32_8 : i32
    %10 = arith.extui %9 : i1 to i32
    %c0_i32_9 = arith.constant 0 : i32
    %11 = arith.cmpi ne, %10, %c0_i32_9 : i32
    scf.if %11 {
      %c0_10 = arith.constant 0 : index
      %c0_11 = arith.constant 0 : index
      %12 = vector.load %arg7[%c0_10, %c0_11] : memref<32x128xf32, #tpu.memory_space<vmem>>, vector<32x128xf32>
      %c0_12 = arith.constant 0 : index
      %c0_13 = arith.constant 0 : index
      %13 = vector.load %arg5[%c0_12, %c0_13] : memref<1x128xf32, #tpu.memory_space<vmem>>, vector<1x128xf32>
      %14 = vector.broadcast %13 : vector<1x128xf32> to vector<32x128xf32>
      %15 = arith.addf %12, %14 : vector<32x128xf32>
      %16 = arith.truncf %15 : vector<32x128xf32> to vector<32x128xbf16>
      %c0_14 = arith.constant 0 : index
      %c0_15 = arith.constant 0 : index
      %17 = vector.load %arg6[%c0_14, %c0_15] : memref<32x128xbf16, #tpu.memory_space<vmem>>, vector<32x128xbf16>
      tpu.vector_store %arg6[%c0_14, %c0_15], %16 {strides = array<i32>} : memref<32x128xbf16, #tpu.memory_space<vmem>>, vector<32x128xbf16>,
    } else {
    }
    return
  }
  func.func @transform_0(%arg0: i32, %arg1: i32, %arg2: i32) -> (i32, i32) {
    %c0_i32 = arith.constant 0 : i32
    return %arg0, %arg2 : i32, i32
  }
  func.func @transform_1(%arg0: i32, %arg1: i32, %arg2: i32) -> (i32, i32) {
    %c0_i32 = arith.constant 0 : i32
    return %arg2, %arg1 : i32, i32
  }
  func.func @transform_2(%arg0: i32, %arg1: i32, %arg2: i32) -> (i32, i32) {
    %c0_i32 = arith.constant 0 : i32
    %c0_i32_0 = arith.constant 0 : i32
    return %c0_i32, %arg1 : i32, i32
  }
  func.func @transform_3(%arg0: i32, %arg1: i32, %arg2: i32) -> (i32, i32) {
    %c0_i32 = arith.constant 0 : i32
    return %arg0, %arg1 : i32, i32
  }
}

</mosaic_0001>

<bundles_post_ra>
// kernel: tpu_custom_call.1
= control target key start
LH: loop header
LB: loop body
LE: loop exit
PB: predicated region body
PF: predicated region fallthrough
CT: control target
= control target key end

     0   :  { %8 = vsyncpa [#allocation4], 0  ;;  %s1091_s0 = inlined_call_operand.hbm [shape: bf16[32,128], index: 0, kind: input, shape index: {}]   ;;  %s1092_s1 = inlined_call_operand.hbm [shape: bf16[128,384], index: 1, kind: input, shape index: {}]   ;;  %s1093_s2 = inlined_call_operand.vmem [shape: f32[1,384], index: 2, kind: input, shape index: {}]   ;;  %s1094_s3 = inlined_call_operand.hbm [shape: bf16[32,384], index: 3, kind: output, shape index: {}]  }
   0x1   :  { %9 = vsyncpa [#allocation7], 0 }
   0x2   :  { %11 = vsyncpa [#allocation7 + $0x1], 0 }
   0x3   :  { %12 = vsyncpa [#allocation5], 0 }
   0x4   :  { %14 = vsyncpa [#allocation5 + $0x1], 0  ;;  %s907_s12 = smov 0   ;;  %s909_s13 = smov 0  }
   0x5   :  { %s911_s14 = smov 0   ;;  %s913_s15 = smov 0  }
   0x6   :  { %s915_s16 = smov 0   ;;  %s917_s17 = smov 0  }
   0x7 LB: > { %1100 = sst [smem:[#allocation12_spill]] %s856_s12  ;;  %s574_s18 = sadd.s32 4294967295, %s876_s17   ;;  %s876_s17 = sphi %s917_s17, %s20_s17   ;;  %s872_s16 = sphi %s915_s16, %s1121_s16   ;;  %s868_s15 = sphi %s913_s15, %s1120_s15   ;;  %s864_s14 = sphi %s911_s14, %s1119_s14   ;;  %s860_s13 = sphi %s909_s13, %s1118_s13   ;;  %s856_s12 = sphi %s907_s12, %s1117_s12  }
   0x8   : > { %s575_s19 = sadd.s32 4294967294, %s876_s17   ;;  %p83_p0 = scmp.ne.s32.totalorder %s864_s14, %s860_s13 }
   0x9   : > { %p84_p1 = scmp.eq.s32.totalorder %s876_s17, 0  ;;  %p89_p2 = scmp.ne.s32.totalorder %s860_s13, %s856_s12 }
   0xa   : > { %p944_p3 = scmp.eq.s32.totalorder %s574_s18, 0  ;;  %p141_p5 = scmp.eq.s32.totalorder %s574_s18, 2 }
   0xb   : > { %p948_p4 = por %p84_p1, %p83_p0  ;;  %p147_p7 = scmp.eq.s32.totalorder %s575_s19, 2 }
   0xc   : > { %p954_p6 = por %p944_p3, %p89_p2  ;;  %p958_p8 = por %p141_p5, %p83_p0 }
   0xd   : > { %p576_p9 = scmp.ge.s32.totalorder %s876_s17, 1  ;;  %p963_p10 = por %p147_p7, %p89_p2 }
   0xe   : > { %s1103_s22 = scalar_select %p954_p6, 1, 0 }
   0xf   : > { %s1104_s23 = scalar_select %p958_p8, 1, 0 }
  0x10   : > { %s1105_s24 = scalar_select %p963_p10, 1, 0 }
  0x11   : > { %p154_p11 = scmp.lt.s32.totalorder %s876_s17, 4  ;;  %s878_s26 = smov [#allocation3]  }
  0x12   : > { %1106 = sst [smem:[#allocation13_spill]] %s1105_s24  ;;  %s170_s27 = sshll.u32 %s878_s26, 4  ;;  %s171_s27 = int_to_ptr.vmem [resolvable:$true] %s170_s27 }
  0x13   : > { %p968_p12 = pnand %p576_p9, %p154_p11  ;;  %p670_p0 = scmp.lt.s32.totalorder %s876_s17, 3 }
  0x14   : > { %s35_s30 = sadd.s32 1, %s872_s16  ;;  %s749_s4 = scalar_lea.vmem %s171_s27, 256 }
  0x15   : > { %p657_p13 = pneg %p968_p12  ;;  %p983_p2 = pnand %p670_p0, %p948_p4 }
  0x16   : > { %p750_p7 = scmp.ne.s32.totalorder %s171_s27, %s749_s4  ;;  %p757_p10 = scmp.lt.s32.totalorder %s171_s27, %s171_s27 }
  0x17   : > { %p977_p1 = pnand %p657_p13, %p944_p3  ;;  %p758_p8 = scmp.lt.s32.totalorder %s749_s4, %s749_s4 }
  0x19   : > { %p740_p5 = pneg %p977_p1  ;;  %p759_p6 = por %p758_p8, %p757_p10 }
  0x1b   : > { %p752_p9 = pnand %p750_p7, %p740_p5 }
  0x1d   : > { %p753_p11 = pneg %p752_p9 }
  0x1f   : > { %p760_p13 = pnand %p759_p6, %p753_p11 }
  0x21   : > { %763 = shalt.err (!%p760_p13)
}
  0x22   : > { %s1099_s5 = smov 64   ;;  %s880_s6 = smov 4  }
  0x23   : > { %660 = dma.hbm_to_vmem [thread:$0]  (!%p977_p1), %s1091_s0, 256, %s171_s27, [#allocation4], %s1099_s5, %s1099_s5, %s880_s6  }
  0x24   : > { %p37_p4 = scmp.ge.s32.totalorder %s35_s30, 3  ;;  %s76_s9 = sadd.s32 1, %s864_s14 }
  0x25   : > { %s184_s10 = sand.u32 1, %s864_s14   ;;  %s580_s19 = sshll.u32 %s872_s16, 6 }
  0x26   : > { %s1123_s30 = smov (%p37_p4, %s35_s30), 0  ;;  %s579_s11 = sshll.u32 %s184_s10, 6 }
  0x27   : > { %s72_s18 = ssub.s32 %s872_s16, %s1123_s30  ;;  %s196_s28 = scalar_lea.hbm %s1092_s1, %s580_s19 }
  0x28   : > { %p74_p6 = scmp.eq.s32.totalorder %s72_s18, 0  ;;  %s188_s4 = scalar_lea.vmem [#allocation6], %s579_s11 }
  0x29   : > { %s197_s24 = sshll.u32 %s188_s4, 4  ;;  %s185_s27 = scalar_lea.sflag [#allocation7], %s184_s10  ;;  %s198_s24 = int_to_ptr.vmem [resolvable:$true] %s197_s24 }
  0x2a   : > { %s1009_s12 = scalar_select %p74_p6, %s864_s14, %s76_s9  }
  0x2b   : > { %p766_p8 = pneg %p983_p2  ;;  %s777_s7 = scalar_lea.vmem %s198_s24, 1024 }
  0x2c   : > { %p778_p10 = scmp.ne.s32.totalorder %s198_s24, %s777_s7  ;;  %s881_s8 = smov [#allocation6]  }
  0x2d   : > { %s782_s5 = sshll.u32 %s881_s8, 4  ;;  %s783_s5 = int_to_ptr.vmem [resolvable:$false] %s782_s5 }
  0x2e   : > { %p780_p0 = pnand %p778_p10, %p766_p8  ;;  %s784_s18 = scalar_lea.vmem %s783_s5, 2048 }
  0x2f   : > { %p785_p5 = scmp.lt.s32.totalorder %s198_s24, %s783_s5  ;;  %p786_p7 = scmp.lt.s32.totalorder %s784_s18, %s777_s7 }
  0x30   : > { %p781_p1 = pneg %p780_p0 }
  0x31   : > { %p787_p9 = por %p786_p7, %p785_p5 }
  0x33   : > { %p788_p11 = pnand %p787_p9, %p781_p1 }
  0x35   : > { %791 = shalt.err (!%p788_p11)
}
  0x36   : > { %s882_s11 = smov 192   ;;  %s1110_s9 = smov 64  }
  0x37   : > { %664 = dma.hbm_to_vmem [thread:$0]  (!%p983_p2), %s196_s28, 1024, %s198_s24, %s185_s27, %s882_s11, %s1110_s9, %s880_s6  }
  0x38   : > { %215 = sbr.rel (%p968_p12) target bundleno = 317 (0x13d), region = 32 }
  0x3d   : > { %843 = dma.done.wait (%p944_p3), [#allocation4], 256  }
  0x3e   : > { %845 = vsyncadd (%p944_p3), [#allocation4], 4294967040  ;;  %s1024_s5 = sand.u32 1, %s860_s13   ;;  %p1111_p13 = scmp.ne.s32.totalorder %s1103_s22, 0 }
  0x3f   : > { %s583_s10 = sshll.u32 %s1024_s5, 6  ;;  %s222_s29 = scalar_lea.sflag [#allocation7], %s1024_s5 }
  0x40   : > { %s225_s19 = scalar_lea.vmem [#allocation6], %s583_s10 }
  0x41   : > { %847 = dma.done.wait (%p1111_p13), %s222_s29, 1024  }
  0x42   : > { %849 = vsyncadd (%p1111_p13), %s222_s29, 4294966272  ;;  %v728_v0 = vld [vmem:[%s225_s19 + $0x38] sm:$0xff]   ;;  %v729_v1 = vld [vmem:[%s225_s19 + $0x30] sm:$0xff]   ;;  %p253_p3 = scmp.lt.s32.totalorder %s868_s15, 2  ;;  %s584_s22 = sshll.u32 %s1024_s5, 4 }
  0x43   : > { %629 = vmatprep.subr.bf16.mxu0 %v728_v0  ;;  %v730_v2 = vld [vmem:[%s225_s19 + $0x28] sm:$0xff]   ;;  %v731_v3 = vld [vmem:[%s225_s19 + $0x20] sm:$0xff]   ;;  %v736_v4 = vld [vmem:[#allocation3] sm:$0xff]   ;;  %s250_s21 = scalar_lea.vmem [#allocation8], %s584_s22  ;;  %s601_s28 = sshll.u32 %s868_s15, 6 }
  0x44   : > { %630 = vmatpush3.bf16.msra.mxu0 %v728_v0  ;;  %645 = vmatprep.mubr.bf16.mxu0 %v736_v4  ;;  %v732_v5 = vld [vmem:[%s225_s19 + $0x18] sm:$0xff]   ;;  %v733_v6 = vld [vmem:[%s225_s19 + $0x10] sm:$0xff]   ;;  %v734_v7 = vld [vmem:[%s225_s19 + $0x8] sm:$0xff]   ;;  %s254_s20 = scalar_select %p253_p3, %s868_s15, 2 }
  0x45   : > { %631 = vmatprep.subr.bf16.mxu0 %v729_v1  ;;  %v735_v8 = vld [vmem:[%s225_s19] sm:$0xff]   ;;  %v737_v9 = vld [vmem:[#allocation3 + $0x8] sm:$0xff]   ;;  %s461_s26 = sshll.u32 %s250_s21, 4  ;;  %s1044_s7 = scalar_lea.hbm %s1094_s3, %s601_s28  ;;  %s1039_s26 = int_to_ptr.vmem [resolvable:$true] %s461_s26 }
  0x46   : > { %s255_s6 = scalar_lea.vmem %s1093_s2, %s254_s20  ;;  %s446_s8 = scalar_lea.sflag [#allocation5], %s1024_s5 }
  0x47   : > { %v595_v11 = vld [vmem:[%s255_s6] ss:$0 sm:$0xff]  ;;  %s792_s18 = scalar_lea.vmem %s1039_s26, 256  ;;  %p1112_p2 = scmp.ne.s32.totalorder %s1104_s23, 0 }
  0x48   : > { %632 = vmatpush3.bf16.msra.mxu0 %v729_v1  ;;  %p793_p12 = scmp.ne.s32.totalorder %s1039_s26, %s792_s18  ;;  %s883_s15 = smov [#allocation8]  }
  0x49   : > { %633 = vmatprep.subr.bf16.mxu0 %v730_v2  ;;  %s796_s11 = sshll.u32 %s883_s15, 4  ;;  %s797_s11 = int_to_ptr.vmem [resolvable:$false] %s796_s11 }
  0x4a   : > { %p794_p4 = pnand %p793_p12, %p1112_p2  ;;  %s798_s9 = scalar_lea.vmem %s797_s11, 512 }
  0x4b   : > { %p799_p8 = scmp.lt.s32.totalorder %s1039_s26, %s797_s11  ;;  %p800_p10 = scmp.lt.s32.totalorder %s798_s9, %s792_s18 }
  0x4c   : > { %634 = vmatpush3.bf16.msra.mxu0 %v730_v2  ;;  %p795_p6 = pneg %p794_p4 }
  0x4d   : > { %635 = vmatprep.subr.bf16.mxu0 %v731_v3  ;;  %p801_p0 = por %p800_p10, %p799_p8 }
  0x4f   : > { %p802_p1 = pnand %p801_p0, %p795_p6 }
  0x50   : > { %636 = vmatpush3.bf16.msra.mxu0 %v731_v3 }
  0x51   : > { %637 = vmatprep.subr.bf16.mxu0 %v732_v5 }
  0x54   : > { %638 = vmatpush3.bf16.msra.mxu0 %v732_v5 }
  0x55   : > { %639 = vmatprep.subr.bf16.mxu0 %v733_v6 }
  0x58   : > { %640 = vmatpush3.bf16.msra.mxu0 %v733_v6 }
  0x59   : > { %641 = vmatprep.subr.bf16.mxu0 %v734_v7 }
  0x5c   : > { %642 = vmatpush3.bf16.msra.mxu0 %v734_v7 }
  0x5d   : > { %643 = vmatprep.subr.bf16.mxu0 %v735_v8 }
  0x60   : > { %644 = vmatpush3.bf16.msra.mxu0 %v735_v8 }
  0x63   : > { %646 = vmatmul.mubr.bf16.vlgmr.msra.gmra.mxu0 %v737_v9 }
 0x123   : > { %v647_v10 = vpop.f32.mrf.mxu0 }
 0x124   : > { %v423_v14 = vadd.f32 %v647_v10, %v595_v11 }
 0x125   : > { %v384_v12 = vpop.f32.mrf.mxu0 }
 0x126   : > { %v421_v17 = vadd.f32 %v595_v11, %v384_v12 }
 0x127   : > { %v648_v13 = vpop.f32.mrf.mxu0 }
 0x128   : > { %v424_v15 = vadd.f32 %v648_v13, %v595_v11 }
 0x129   : > { %v387_v16 = vpop.f32.mrf.mxu0 }
 0x12a   : > { %v616_v18 = vpack.c.bf16 %v424_v15, %v423_v14  ;;  %v422_v19 = vadd.f32 %v595_v11, %v387_v16 }
 0x12c   : > { %618 = vst [vmem:[%s250_s21 + $0x8] sm:$0xff] %v616_v18   ;;  %v611_v20 = vpack.c.bf16 %v422_v19, %v421_v17 }
 0x12e   : > { %612 = vst [vmem:[%s250_s21] sm:$0xff] %v611_v20  }
 0x12f   : > { %805 = shalt.err (!%p802_p1)
}
 0x130   : > { %s806_s10 = scalar_lea.hbm %s1044_s7, 256  ;;  %s810_s20 = scalar_lea.hbm %s1094_s3, 768 }
 0x131   : > { %p807_p5 = scmp.ne.s32.totalorder %s1044_s7, %s806_s10  ;;  %p811_p11 = scmp.lt.s32.totalorder %s1044_s7, %s1094_s3 }
 0x132   : > { %p812_p13 = scmp.lt.s32.totalorder %s810_s20, %s806_s10 }
 0x133   : > { %p808_p7 = pnand %p807_p5, %p1112_p2 }
 0x134   : > { %p813_p3 = por %p812_p13, %p811_p11 }
 0x135   : > { %p809_p9 = pneg %p808_p7 }
 0x137   : > { %p814_p12 = pnand %p813_p3, %p809_p9 }
 0x139   : > { %817 = shalt.err (!%p814_p12)
}
 0x13a   : > { %s884_s25 = smov 64   ;;  %s885_s6 = smov 192  }
 0x13b   : > { %s886_s21 = smov 4  }
 0x13c   : > { %655 = dma.vmem_to_hbm [thread:$0]  (%p1112_p2), %s1039_s26, 256, %s1044_s7, %s446_s8, %s884_s25, %s885_s6, %s886_s21  }
 0x13d PF: > { %s1113_s28 = sld [smem:[#allocation12_spill]]  ;;  %p672_p4 = scmp.ge.s32.totalorder %s876_s17, 2 }
 0x13e   : > { %s1114_s4 = sld [smem:[#allocation13_spill]] }
 0x143   : > { %s476_s27 = sand.u32 1, %s1113_s28  }
 0x144   : > { %p1115_p6 = scmp.ne.s32.totalorder %s1114_s4, 0  ;;  %s477_s18 = scalar_lea.sflag [#allocation5], %s476_s27 }
 0x146   : > { %p666_p8 = pnand %p672_p4, %p1115_p6 }
 0x148   : > { %p667_p10 = pneg %p666_p8 }
 0x14a   : > { %851 = dma.done.wait (%p667_p10), %s477_s18, 256  }
 0x14b   : > { %853 = vsyncadd (%p667_p10), %s477_s18, 4294967040  ;;  %s20_s17 = sadd.s32 1, %s876_s17   ;;  %s1116_s23 = smov %s1009_s12 }
 0x14c   : > { %p17_p0 = scmp.ge.s32.totalorder %s20_s17, 5   ;;  %s1117_s12 = smov %s860_s13 }
 0x14d   : > { %s1118_s13 = smov %s864_s14  ;;  %s1119_s14 = smov %s1116_s23 }
 0x14e   : > { %s1120_s15 = smov %s872_s16  ;;  %s1121_s16 = smov %s1123_s30 }
 0x14f   :  { %19 = sbr.rel (!%p17_p0) target bundleno = 7 (0x7), region = 94 }
 0x154   :  { %482 = vsyncpa [#allocation4], 1 }
 0x155   :  { %484 = vsyncpa [#allocation4 + $0x1], 1 }
 0x156   :  { %485 = vsyncpa [#allocation7], 1 }
 0x157   :  { %487 = vsyncpa [#allocation7 + $0x1], 1 }
 0x158   :  { %488 = vsyncpa [#allocation5], 1 }
 0x159   :  { %490 = vsyncpa [#allocation5 + $0x1], 1 }

</bundles_post_ra>
